<compile_context>
chip_gen: v6e
topology: v6e:2x2x1
jax: 0.10.0
libtpu: 0.0.40
codegen_flags: <defaults>
</compile_context>

<pallas_src>
import math

import jax
import jax.numpy as jnp
from jax.experimental import pallas as pl
from jax.experimental.pallas import tpu as pltpu


def _pe3d_assemble_kernel(x_ref, y_ref, z_ref, o_ref):
    """Assemble one (1, 3*C2, 1, ty, dz) output block.

    x_ref : (1, C2, 1, 1)   sin/cos values for this x-slice (scalar per channel)
    y_ref : (C2, ty, 1)     sin/cos values along y for this y-tile
    z_ref : (C2, 1, dz)     sin/cos values along z (full)
    o_ref : (1, 3*C2, 1, ty, dz)
    """
    c2 = x_ref.shape[1]
    ty = y_ref.shape[1]
    dz = z_ref.shape[2]
    full = (c2, ty, dz)
    dt = o_ref.dtype

    # x-axis group: scalar-per-channel splat over the (ty, dz) tile.
    o_ref[0, 0:c2, 0, :, :] = jnp.broadcast_to(x_ref[0, :, :, :], full).astype(dt)
    # y-axis group: broadcast along lanes (z).
    o_ref[0, c2:2 * c2, 0, :, :] = jnp.broadcast_to(y_ref[:, :, :], full).astype(dt)
    # z-axis group: broadcast along sublanes (y).
    o_ref[0, 2 * c2:3 * c2, 0, :, :] = jnp.broadcast_to(z_ref[:, :, :], full).astype(dt)


def _pick_y_tile(dy, dz, out_c, itemsize, budget_bytes=6 * 1024 * 1024):
    """Largest y-tile (full dy, else a multiple-of-8 divisor) fitting the budget."""
    def fits(t):
        return out_c * t * dz * itemsize <= budget_bytes

    if fits(dy):
        return dy
    best = 0
    for t in range(8, dy, 8):
        if dy % t == 0 and fits(t):
            best = t
    return best if best else dy


def positional_encoding_3d_forward(x, channels):
    """PositionalEncoding3D(channels).forward(x) -> (B, 3*channels, dx, dy, dz)."""
    b = x.shape[0]
    dx, dy, dz = x.shape[2], x.shape[3], x.shape[4]
    dtype = x.dtype

    # div_term = exp(arange(0, channels, 2) * (-log(10000)/channels))
    div = jnp.exp(jnp.arange(0, channels, 2, dtype=jnp.float32)
                  * (-math.log(10000.0) / channels))
    c_half = div.shape[0]
    c2 = 2 * c_half
    out_c = 3 * c2

    def sincos_table(n):
        t = jnp.arange(n, dtype=jnp.float32)[:, None] * div[None, :]   # (n, c_half)
        return jnp.concatenate([jnp.sin(t), jnp.cos(t)], axis=-1)      # (n, c2)

    # Orient tables so the encoding-channel axis is a major dim inside the kernel.
    x_tab = sincos_table(dx).reshape(dx, c2, 1, 1)      # (dx, c2, 1, 1)
    y_tab = sincos_table(dy).T.reshape(c2, dy, 1)       # (c2, dy, 1)
    z_tab = sincos_table(dz).T.reshape(c2, 1, dz)       # (c2, 1, dz)

    itemsize = jnp.dtype(dtype).itemsize
    ty = _pick_y_tile(dy, dz, out_c, itemsize)
    ny = dy // ty
    grid = (b, dx, ny)

    out = pl.pallas_call(
        _pe3d_assemble_kernel,
        out_shape=jax.ShapeDtypeStruct((b, out_c, dx, dy, dz), dtype),
        grid=grid,
        in_specs=[
            pl.BlockSpec((1, c2, 1, 1), lambda n, i, j: (i, 0, 0, 0)),   # x table slice
            pl.BlockSpec((c2, ty, 1), lambda n, i, j: (0, j, 0)),        # y table tile
            pl.BlockSpec((c2, 1, dz), lambda n, i, j: (0, 0, 0)),        # z table (full)
        ],
        out_specs=pl.BlockSpec((1, out_c, 1, ty, dz),
                               lambda n, i, j: (n, 0, i, j, 0)),
        compiler_params=pltpu.CompilerParams(
            dimension_semantics=("parallel", "parallel", "parallel"),
            vmem_limit_bytes=32 * 1024 * 1024,
        ),
    )(x_tab, y_tab, z_tab)
    return out


def _reference(x, channels):
    """Pure-JAX transcription of the PyTorch module, for correctness checking."""
    b = x.shape[0]
    dx, dy, dz = x.shape[2], x.shape[3], x.shape[4]
    div = jnp.exp(jnp.arange(0, channels, 2, dtype=jnp.float32)
                  * (-math.log(10000.0) / channels))
    c2 = 2 * div.shape[0]

    def pe1(n):
        t = jnp.arange(n, dtype=jnp.float32)[:, None] * div[None, :]
        return jnp.concatenate([jnp.sin(t), jnp.cos(t)], axis=-1)

    pe_x = jnp.broadcast_to(pe1(dx)[:, None, None, :], (dx, dy, dz, c2))
    pe_y = jnp.broadcast_to(pe1(dy)[None, :, None, :], (dx, dy, dz, c2))
    pe_z = jnp.broadcast_to(pe1(dz)[None, None, :, :], (dx, dy, dz, c2))
    pe = jnp.transpose(jnp.concatenate([pe_x, pe_y, pe_z], axis=-1), (3, 0, 1, 2))
    return jnp.broadcast_to(pe[None], (b,) + pe.shape).astype(x.dtype)


if __name__ == "__main__":
    key = jax.random.PRNGKey(0)
    channels = 4                                  # module constructor arg
    # x: (B, C, dim_x, dim_y, dim_z); only shape/dtype are used by the forward.
    x = jax.random.normal(key, (2, 4, 4, 8, 16), jnp.float32)

    out = positional_encoding_3d_forward(x, channels)
    out = jax.block_until_ready(out)

    assert out.shape == (2, 3 * channels, 4, 8, 16), out.shape
    assert out.dtype == x.dtype, out.dtype

    ref = _reference(x, channels)
    assert bool(jnp.allclose(out, ref, atol=1e-6, rtol=1e-6)), \
        float(jnp.max(jnp.abs(out - ref)))
    print("KERNEL_OK")
</pallas_src>

<mosaic_0001>
module attributes {stable_mosaic.version = 11 : i64} {
  func.func @_pe3d_assemble_kernel(%arg0: i32, %arg1: i32, %arg2: i32, %arg3: memref<1x4x1x1xf32, #tpu.memory_space<vmem>>, %arg4: memref<4x8x1xf32, #tpu.memory_space<vmem>>, %arg5: memref<4x1x16xf32, #tpu.memory_space<vmem>>, %arg6: memref<1x12x1x8x16xf32, #tpu.memory_space<vmem>>) attributes {dimension_semantics = [#tpu.dimension_semantics<parallel>, #tpu.dimension_semantics<parallel>, #tpu.dimension_semantics<parallel>], iteration_bounds = array<i64: 2, 4, 1>, scalar_prefetch = 0 : i64, scratch_operands = 0 : i64, tpu.core_type = #tpu.core_type<tc>, window_params = [{transform_indices = @transform_0, window_bounds = array<i64: 1, 4, 1, 1>}, {transform_indices = @transform_1, window_bounds = array<i64: 4, 8, 1>}, {pipeline_mode = #tpu.pipeline_mode<synchronous>, transform_indices = @transform_2, window_bounds = array<i64: 4, 1, 16>}, {transform_indices = @transform_3, window_bounds = array<i64: 1, 12, 1, 8, 16>}]} {
    %c0 = arith.constant 0 : index
    %c0_0 = arith.constant 0 : index
    %c0_1 = arith.constant 0 : index
    %c0_2 = arith.constant 0 : index
    %0 = vector.load %arg3[%c0, %c0_0, %c0_1, %c0_2] : memref<1x4x1x1xf32, #tpu.memory_space<vmem>>, vector<1x4x1x1xf32>
    %1 = vector.shape_cast %0 : vector<1x4x1x1xf32> to vector<4x1x1xf32>
    %2 = vector.shape_cast %1 : vector<4x1x1xf32> to vector<4x1x1xf32>
    %3 = vector.broadcast %2 : vector<4x1x1xf32> to vector<4x8x16xf32>
    %c0_3 = arith.constant 0 : index
    %c0_4 = arith.constant 0 : index
    %c0_5 = arith.constant 0 : index
    %c0_6 = arith.constant 0 : index
    %c0_7 = arith.constant 0 : index
    %4 = vector.load %arg6[%c0_3, %c0_4, %c0_5, %c0_6, %c0_7] : memref<1x12x1x8x16xf32, #tpu.memory_space<vmem>>, vector<1x4x1x8x16xf32>
    %5 = vector.shape_cast %4 : vector<1x4x1x8x16xf32> to vector<4x8x16xf32>
    %6 = vector.shape_cast %3 : vector<4x8x16xf32> to vector<1x4x1x8x16xf32>
    tpu.vector_store %arg6[%c0_3, %c0_4, %c0_5, %c0_6, %c0_7], %6 {strides = array<i32>} : memref<1x12x1x8x16xf32, #tpu.memory_space<vmem>>, vector<1x4x1x8x16xf32>,
    %c0_8 = arith.constant 0 : index
    %c0_9 = arith.constant 0 : index
    %c0_10 = arith.constant 0 : index
    %7 = vector.load %arg4[%c0_8, %c0_9, %c0_10] : memref<4x8x1xf32, #tpu.memory_space<vmem>>, vector<4x8x1xf32>
    %8 = vector.shape_cast %7 : vector<4x8x1xf32> to vector<4x8x1xf32>
    %9 = vector.broadcast %8 : vector<4x8x1xf32> to vector<4x8x16xf32>
    %c0_11 = arith.constant 0 : index
    %c4 = arith.constant 4 : index
    %c0_12 = arith.constant 0 : index
    %c0_13 = arith.constant 0 : index
    %c0_14 = arith.constant 0 : index
    %10 = vector.load %arg6[%c0_11, %c4, %c0_12, %c0_13, %c0_14] : memref<1x12x1x8x16xf32, #tpu.memory_space<vmem>>, vector<1x4x1x8x16xf32>
    %11 = vector.shape_cast %10 : vector<1x4x1x8x16xf32> to vector<4x8x16xf32>
    %12 = vector.shape_cast %9 : vector<4x8x16xf32> to vector<1x4x1x8x16xf32>
    tpu.vector_store %arg6[%c0_11, %c4, %c0_12, %c0_13, %c0_14], %12 {strides = array<i32>} : memref<1x12x1x8x16xf32, #tpu.memory_space<vmem>>, vector<1x4x1x8x16xf32>,
    %c0_15 = arith.constant 0 : index
    %c0_16 = arith.constant 0 : index
    %c0_17 = arith.constant 0 : index
    %13 = vector.load %arg5[%c0_15, %c0_16, %c0_17] : memref<4x1x16xf32, #tpu.memory_space<vmem>>, vector<4x1x16xf32>
    %14 = vector.shape_cast %13 : vector<4x1x16xf32> to vector<4x1x16xf32>
    %15 = vector.broadcast %14 : vector<4x1x16xf32> to vector<4x8x16xf32>
    %c0_18 = arith.constant 0 : index
    %c8 = arith.constant 8 : index
    %c0_19 = arith.constant 0 : index
    %c0_20 = arith.constant 0 : index
    %c0_21 = arith.constant 0 : index
    %16 = vector.load %arg6[%c0_18, %c8, %c0_19, %c0_20, %c0_21] : memref<1x12x1x8x16xf32, #tpu.memory_space<vmem>>, vector<1x4x1x8x16xf32>
    %17 = vector.shape_cast %16 : vector<1x4x1x8x16xf32> to vector<4x8x16xf32>
    %18 = vector.shape_cast %15 : vector<4x8x16xf32> to vector<1x4x1x8x16xf32>
    tpu.vector_store %arg6[%c0_18, %c8, %c0_19, %c0_20, %c0_21], %18 {strides = array<i32>} : memref<1x12x1x8x16xf32, #tpu.memory_space<vmem>>, vector<1x4x1x8x16xf32>,
    return
  }
  func.func @transform_0(%arg0: i32, %arg1: i32, %arg2: i32) -> (i32, i32, i32, i32) {
    %c0_i32 = arith.constant 0 : i32
    %c0_i32_0 = arith.constant 0 : i32
    %c0_i32_1 = arith.constant 0 : i32
    %c0_i32_2 = arith.constant 0 : i32
    return %arg1, %c0_i32, %c0_i32_0, %c0_i32_1 : i32, i32, i32, i32
  }
  func.func @transform_1(%arg0: i32, %arg1: i32, %arg2: i32) -> (i32, i32, i32) {
    %c0_i32 = arith.constant 0 : i32
    %c0_i32_0 = arith.constant 0 : i32
    %c0_i32_1 = arith.constant 0 : i32
    return %c0_i32, %arg2, %c0_i32_0 : i32, i32, i32
  }
  func.func @transform_2(%arg0: i32, %arg1: i32, %arg2: i32) -> (i32, i32, i32) {
    %c0_i32 = arith.constant 0 : i32
    %c0_i32_0 = arith.constant 0 : i32
    %c0_i32_1 = arith.constant 0 : i32
    %c0_i32_2 = arith.constant 0 : i32
    return %c0_i32, %c0_i32_0, %c0_i32_1 : i32, i32, i32
  }
  func.func @transform_3(%arg0: i32, %arg1: i32, %arg2: i32) -> (i32, i32, i32, i32, i32) {
    %c0_i32 = arith.constant 0 : i32
    %c0_i32_0 = arith.constant 0 : i32
    %c0_i32_1 = arith.constant 0 : i32
    return %arg0, %c0_i32, %arg1, %arg2, %c0_i32_0 : i32, i32, i32, i32, i32
  }
}

</mosaic_0001>

<bundles_post_ra>
// kernel: tpu_custom_call.1
= control target key start
LH: loop header
LB: loop body
LE: loop exit
PB: predicated region body
PF: predicated region fallthrough
CT: control target
= control target key end

     0   :  { %8 = vsyncpa [#allocation3], 0  ;;  %s839_s0 = inlined_call_operand.vmem [shape: f32[4,4,1,1], index: 0, kind: input, shape index: {}]   ;;  %s840_s1 = inlined_call_operand.vmem [shape: f32[4,8,1], index: 1, kind: input, shape index: {}]   ;;  %s841_s2 = inlined_call_operand.vmem [shape: f32[4,1,16], index: 2, kind: input, shape index: {}]   ;;  %s842_s3 = inlined_call_operand.hbm [shape: f32[2,12,4,8,16], index: 3, kind: output, shape index: {}]  }
   0x1   :  { %10 = vsyncpa [#allocation3 + $0x1], 0  ;;  %s647_s12 = smov 0   ;;  %s649_s13 = smov 0  }
   0x2   :  { %s651_s14 = smov 0   ;;  %s653_s15 = smov 0  }
   0x3   :  { %s655_s16 = smov 0   ;;  %s657_s17 = smov 0  }
   0x4   :  { %s659_s18 = smov 0   ;;  %s661_s19 = smov 0  }
   0x5 LB: > { %s423_s20 = sadd.s32 4294967295, %s620_s19   ;;  %s424_s21 = sadd.s32 4294967294, %s620_s19   ;;  %s620_s19 = sphi %s661_s19, %s16_s19   ;;  %s616_s18 = sphi %s659_s18, %s851_s18   ;;  %s612_s17 = sphi %s657_s17, %s850_s17   ;;  %s608_s16 = sphi %s655_s16, %s849_s16   ;;  %s604_s15 = sphi %s653_s15, %s848_s15   ;;  %s600_s14 = sphi %s651_s14, %s847_s14   ;;  %s596_s13 = sphi %s649_s13, %s846_s13   ;;  %s592_s12 = sphi %s647_s12, %s845_s12  }
   0x6   : > { %s31_s22 = sadd.s32 1, %s612_s17  ;;  %s35_s23 = sadd.s32 1, %s616_s18 }
   0x7   : > { %p33_p0 = scmp.ge.s32.totalorder %s31_s22, 4  ;;  %p129_p1 = scmp.ne.s32.totalorder %s600_s14, %s596_s13 }
   0x8   : > { %p130_p2 = scmp.eq.s32.totalorder %s423_s20, 7  ;;  %p135_p5 = scmp.ne.s32.totalorder %s596_s13, %s592_s12 }
   0x9   : > { %s853_s22 = smov (%p33_p0, %s31_s22), 0  ;;  %s855_s23 = smov (!%p33_p0, %s35_s23), %s616_s18 }
   0xa   : > { %s113_s24 = ssub.s32 %s612_s17, %s853_s22  ;;  %p698_p3 = por %p130_p2, %p129_p1 }
   0xb   : > { %p37_p4 = scmp.ge.s32.totalorder %s855_s23, 2  ;;  %p136_p6 = scmp.eq.s32.totalorder %s424_s21, 7 }
   0xc   : > { %p428_p7 = scmp.ge.s32.totalorder %s620_s19, 1  ;;  %p171_p9 = scmp.lt.s32.totalorder %s620_s19, 9 }
   0xd   : > { %s857_s23 = smov (%p37_p4, %s855_s23), 0  ;;  %p707_p8 = por %p136_p6, %p135_p5 }
   0xe   : > { %s112_s27 = ssub.s32 %s616_s18, %s857_s23  ;;  %s119_s28 = sadd.s32 1, %s600_s14 }
   0xf   : > { %s114_s29 = sor.u32 %s113_s24, %s112_s27  ;;  %p172_p10 = pnand %p428_p7, %p171_p9 }
  0x10   : > { %p117_p11 = scmp.eq.s32.totalorder %s114_s29, 0  ;;  %p198_p12 = scmp.lt.s32.totalorder (!%p172_p10), %s604_s15, 3 }
  0x11   : > { %175 = sbr.rel (%p172_p10) target bundleno = 178 (0xb2), region = 32  ;;  %s195_s4 = sand.u32 (!%p172_p10), 1, %s596_s13  }
  0x12   : > { %s716_s30 = scalar_select %p117_p11, %s600_s14, %s119_s28  }
  0x13   : > { %s449_s24 = smul.u32 (!%p172_p10), 96, %s195_s4  ;;  %s788_s8 = scalar_lea.sflag (!%p172_p10), [#allocation3], %s195_s4 }
  0x14   : > { %s623_s10 = smov (!%p172_p10), [#allocation2]  }
  0x15   : > { %s738_s7 = scalar_lea.vmem (!%p172_p10), [#allocation2], %s449_s24  ;;  %s532_s11 = sshll.u32 (!%p172_p10), %s623_s10, 4  ;;  %s533_s11 = int_to_ptr.vmem [resolvable:$false] %s532_s11 }
  0x16   : > { %v622_v0 = vmov 0   ;;  %s199_s5 = scalar_select %p198_p12, %s604_s15, 3  ;;  %v438_v1 = vld [vmem:[%s841_s2] ss:$0 sm:$0xff]  ;;  %v439_v2 = vld [vmem:[%s841_s2 + $0x1] ss:$0 sm:$0xff] }
  0x17   : > { %527 = vset.pattern.permute.xlu1 %v622_v0  ;;  %526 = vset.pattern.permute.xlu0 %v622_v0  ;;  %v440_v3 = vld [vmem:[%s841_s2 + $0x2] ss:$0 sm:$0xff]  ;;  %v441_v4 = vld [vmem:[%s841_s2 + $0x3] ss:$0 sm:$0xff]  ;;  %vm246_vm0 = vcmask 130048   ;;  %v252_v9 = vld [vmem:[%s840_s1 + $0x8] sm:$0xff] }
  0x18   : > { %s429_s27 = sshll.u32 %s199_s5, 2  ;;  %442 = vst.msk [vmem:[%s738_s7 + $0x40] sm:$0xff] %vm246_vm0, %v438_v1  ;;  %443 = vst.msk [vmem:[%s738_s7 + $0x48] sm:$0xff] %vm246_vm0, %v439_v2  ;;  %v251_v10 = vld [vmem:[%s840_s1] sm:$0xff]  ;;  %v254_v11 = vld [vmem:[%s840_s1 + $0x18] sm:$0xff]  ;;  %s534_s20 = scalar_lea.vmem %s533_s11, 3072 }
  0x19   : > { %s201_s6 = scalar_lea.vmem %s839_s0, %s429_s27  ;;  %444 = vst.msk [vmem:[%s738_s7 + $0x50] sm:$0xff] %vm246_vm0, %v440_v3  ;;  %445 = vst.msk [vmem:[%s738_s7 + $0x58] sm:$0xff] %vm246_vm0, %v441_v4  ;;  %v253_v12 = vld [vmem:[%s840_s1 + $0x10] sm:$0xff]  ;;  %s450_s27 = smul.u32 48, %s608_s16 }
  0x1a   : > { %v432_v5 = vld [vmem:[%s201_s6 + $0x2] ss:$0 sm:$0xff]  ;;  %v430_v6 = vld [vmem:[%s201_s6] ss:$0 sm:$0xff]  ;;  %v433_v7 = vld [vmem:[%s201_s6 + $0x3] ss:$0 sm:$0xff] }
  0x1b   : > { %239 = vperm.xlu1 %527, %v432_v5   ;;  %231 = vperm.xlu0 %526, %v430_v6   ;;  %v431_v8 = vld [vmem:[%s201_s6 + $0x1] ss:$0 sm:$0xff]  ;;  %s326_s28 = sadd.s32 %s604_s15, %s450_s27  ;;  %s329_s6 = sshll.u32 %s738_s7, 4  ;;  %s780_s6 = int_to_ptr.vmem [resolvable:$true] %s329_s6 }
  0x1c   : > { %s446_s29 = sshll.u32 %s326_s28, 7  ;;  %s528_s9 = scalar_lea.vmem %s780_s6, 1536 }
  0x1d   : > { %s778_s15 = scalar_lea.hbm %s842_s3, %s446_s29  ;;  %p529_p13 = scmp.ne.s32.totalorder %s780_s6, %s528_s9 }
  0x1e   : > { %p535_p2 = scmp.lt.s32.totalorder %s780_s6, %s533_s11  ;;  %p536_p4 = scmp.lt.s32.totalorder %s534_s20, %s528_s9 }
  0x1f   : > { %243 = vperm.xlu1 %527, %v433_v7   ;;  %235 = vperm.xlu0 %526, %v431_v8   ;;  %p530_p0 = pnand %p529_p13, %p698_p3 }
  0x20   : > { %p537_p5 = por %p536_p4, %p535_p2 }
  0x21   : > { %p531_p1 = pneg %p530_p0 }
  0x23   : > { %262 = vperm.xlu1 %527, %v252_v9   ;;  %257 = vperm.xlu0 %526, %v251_v10   ;;  %p538_p6 = pnand %p537_p5, %p531_p1 }
  0x27   : > { %272 = vperm.xlu1 %527, %v254_v11   ;;  %267 = vperm.xlu0 %526, %v253_v12  }
  0x96   : > { %v240_v13 = vpop.permute.xlu1 %239  ;;  %v232_v14 = vpop.permute.xlu0 %231 }
  0x97   : > { %249 = vst.msk [vmem:[%s738_s7 + $0x10] sm:$0xff] %vm246_vm0, %v240_v13  ;;  %247 = vst.msk [vmem:[%s738_s7] sm:$0xff] %vm246_vm0, %v232_v14 }
  0x9a   : > { %v244_v15 = vpop.permute.xlu1 %243  ;;  %v236_v16 = vpop.permute.xlu0 %235 }
  0x9b   : > { %250 = vst.msk [vmem:[%s738_s7 + $0x18] sm:$0xff] %vm246_vm0, %v244_v15  ;;  %248 = vst.msk [vmem:[%s738_s7 + $0x8] sm:$0xff] %vm246_vm0, %v236_v16 }
  0x9e   : > { %v263_v17 = vpop.permute.xlu1 %262  ;;  %v258_v18 = vpop.permute.xlu0 %257 }
  0x9f   : > { %435 = vst.msk [vmem:[%s738_s7 + $0x28] sm:$0xff] %vm246_vm0, %v263_v17  ;;  %434 = vst.msk [vmem:[%s738_s7 + $0x20] sm:$0xff] %vm246_vm0, %v258_v18 }
  0xa2   : > { %v273_v19 = vpop.permute.xlu1 %272  ;;  %v268_v20 = vpop.permute.xlu0 %267 }
  0xa3   : > { %437 = vst.msk [vmem:[%s738_s7 + $0x38] sm:$0xff] %vm246_vm0, %v273_v19  ;;  %436 = vst.msk [vmem:[%s738_s7 + $0x30] sm:$0xff] %vm246_vm0, %v268_v20 }
  0xa4   : > { %541 = shalt.err (!%p538_p6)
}
  0xa5   : > { %s542_s4 = scalar_lea.hbm %s778_s15, 1536  ;;  %s546_s24 = scalar_lea.hbm %s842_s3, 12288 }
  0xa6   : > { %p543_p7 = scmp.ne.s32.totalorder %s778_s15, %s542_s4  ;;  %p547_p11 = scmp.lt.s32.totalorder %s778_s15, %s842_s3 }
  0xa7   : > { %p548_p12 = scmp.lt.s32.totalorder %s546_s24, %s542_s4 }
  0xa8   : > { %p544_p9 = pnand %p543_p7, %p698_p3 }
  0xa9   : > { %p549_p13 = por %p548_p12, %p547_p11 }
  0xaa   : > { %p545_p10 = pneg %p544_p9 }
  0xac   : > { %p550_p0 = pnand %p549_p13, %p545_p10 }
  0xae   : > { %553 = shalt.err (!%p550_p0)
}
  0xaf   : > { %s624_s29 = smov 128   ;;  %s625_s16 = smov 512  }
  0xb0   : > { %s626_s5 = smov 8  }
  0xb1   : > { %451 = dma.vmem_to_hbm [thread:$0]  (%p698_p3), %s780_s6, 1536, %s778_s15, %s788_s8, %s624_s29, %s625_s16, %s626_s5  }
  0xb2 PF: > { %p457_p1 = scmp.ge.s32.totalorder %s620_s19, 2  ;;  %s344_s9 = sand.u32 1, %s592_s12  }
  0xb3   : > { %s345_s10 = scalar_lea.sflag [#allocation3], %s344_s9 }
  0xb4   : > { %p454_p2 = pnand %p457_p1, %p707_p8 }
  0xb6   : > { %p455_p4 = pneg %p454_p2 }
  0xb8   : > { %587 = dma.done.wait (%p455_p4), %s345_s10, 1536  }
  0xb9   : > { %589 = vsyncadd (%p455_p4), %s345_s10, 4294965760  ;;  %s16_s19 = sadd.s32 1, %s620_s19   ;;  %s845_s12 = smov %s596_s13 }
  0xba   : > { %p13_p5 = scmp.ge.s32.totalorder %s16_s19, 10   ;;  %s846_s13 = smov %s600_s14 }
  0xbb   : > { %s847_s14 = smov %s716_s30  ;;  %s848_s15 = smov %s612_s17 }
  0xbc   : > { %s849_s16 = smov %s616_s18  ;;  %s850_s17 = smov %s853_s22 }
  0xbd   : > { %s851_s18 = smov %s857_s23  ;;  %15 = sbr.rel (!%p13_p5) target bundleno = 5 (0x5), region = 72 }
  0xc2   :  { %350 = vsyncpa [#allocation3], 1 }
  0xc3   :  { %352 = vsyncpa [#allocation3 + $0x1], 1 }

</bundles_post_ra>
